<compile_context>
chip_gen: v7x
topology: tpu7x:2x2x1
jax: 0.10.0
libtpu: 0.0.40
codegen_flags: <defaults>
</compile_context>

<pallas_src>
import functools

import jax
import jax.numpy as jnp
from jax.experimental import pallas as pl
from jax.experimental.pallas import tpu as pltpu

_LANE = 128


def _round_up(n, m):
    return ((n + m - 1) // m) * m


def _vmem_plan():
    """Generation-aware (double-buffered input budget, vmem_limit) in bytes."""
    try:
        cap = int(pltpu.get_tpu_info().vmem_capacity_bytes)
    except Exception:
        cap = 0
    if cap >= 96 * 1024 * 1024:
        # v5e / v6e: 128 MiB VMEM per core -> bigger blocks, fewer grid steps.
        return 48 * 1024 * 1024, 96 * 1024 * 1024
    # v7x (64 MiB per TensorCore) or unknown: stay well under the physical cap.
    return 32 * 1024 * 1024, 56 * 1024 * 1024


def _avgmax_pool_kernel(L, tl, lps, first_masked_block, any_mask,
                        x_ref, psum_ref, pmax_ref, sum_sc, max_sc):
    s = pl.program_id(1)   # reduction-split index (parallel)
    j = pl.program_id(2)   # reduction block index within this split (arbitrary)

    @pl.when(j == 0)
    def _():
        sum_sc[...] = jnp.zeros_like(sum_sc)
        max_sc[...] = jnp.full_like(max_sc, -jnp.inf)

    blk = x_ref[...]                       # native dtype (packed bf16 for max)
    blk_f32 = blk.astype(jnp.float32)      # f32 upcast only for the sum path

    def _accumulate_unmasked():
        sum_sc[...] = sum_sc[...] + jnp.sum(blk_f32, axis=-1, keepdims=True)
        max_sc[...] = jnp.maximum(
            max_sc[...],
            jnp.max(blk, axis=-1, keepdims=True).astype(jnp.float32))

    if any_mask:
        abs_j = s * lps + j

        # Fast path for every block that is fully in-bounds.
        pl.when(abs_j < first_masked_block)(_accumulate_unmasked)

        # Masked path runs only on the ragged tail block and on clamped
        # (fully out-of-range) duplicate blocks of the last split.
        @pl.when(abs_j >= first_masked_block)
        def _():
            lane = jax.lax.broadcasted_iota(jnp.int32, blk.shape, dimension=1)
            valid = (abs_j * tl + lane) < L
            sum_sc[...] = sum_sc[...] + jnp.sum(
                jnp.where(valid, blk_f32, 0.0), axis=-1, keepdims=True)
            max_sc[...] = jnp.maximum(
                max_sc[...],
                jnp.max(jnp.where(valid, blk_f32, -jnp.inf),
                        axis=-1, keepdims=True))
    else:
        _accumulate_unmasked()

    @pl.when(j == pl.num_programs(2) - 1)
    def _():
        psum_ref[0] = sum_sc[...]
        pmax_ref[0] = max_sc[...]


def adaptive_avgmax_pool3d(x, output_size=1, *, _force_tl=None):
    """x: (N, C, D, H, W) -> (N, C, 1, 1, 1), matching the PyTorch module."""
    if output_size != 1:
        # TODO(synk): general adaptive output_size>1 (variable-window pooling) not implemented.
        raise NotImplementedError("only output_size=1 is supported")
    if not jnp.issubdtype(x.dtype, jnp.floating):
        raise NotImplementedError("only floating-point inputs are supported")

    N, C, D, H, W = x.shape
    rows = N * C
    L = D * H * W

    # Keep the native dtype in HBM; upcast happens in VMEM inside the kernel.
    x2 = x.reshape(rows, L)

    itemsize = jnp.dtype(x.dtype).itemsize
    row_align = {4: 8, 2: 16, 1: 32}.get(itemsize, 8)

    # Row tile: bounded and sublane-aligned; split rows into >=2 blocks when
    # possible so the parallel axis can shard across v7x's two TensorCores.
    tr = min(256, _round_up(rows, row_align))
    if pl.cdiv(rows, tr) == 1 and rows >= 2 * row_align:
        tr = _round_up((rows + 1) // 2, row_align)

    # Reduction tile: largest lane-aligned tile whose double-buffered input
    # block fits the generation-aware VMEM budget.
    input_vmem_budget, vmem_limit = _vmem_plan()
    max_tl = input_vmem_budget // (2 * tr * itemsize)
    if max_tl >= 512:
        max_tl = (max_tl // 512) * 512
    else:
        max_tl = max(_LANE, (max_tl // _LANE) * _LANE)
    L_padded = _round_up(L, _LANE)
    tl = min(max_tl, L_padded)
    if _force_tl is not None:            # testing hook for small-shape coverage
        tl = min(_round_up(_force_tl, _LANE), L_padded)

    row_blocks = pl.cdiv(rows, tr)
    total_l_blocks = pl.cdiv(L, tl)

    # If there is only one row block but several reduction blocks, split the
    # reduction dimension across a second *parallel* axis (2 halves) so both
    # v7x TensorCores get work; per-half partials are combined in the wrapper.
    n_split = 2 if (row_blocks == 1 and total_l_blocks >= 2) else 1
    lps = pl.cdiv(total_l_blocks, n_split)       # reduction blocks per split

    ragged = (L % tl) != 0
    any_mask = ragged or (n_split * lps > total_l_blocks)
    first_masked_block = (total_l_blocks - 1) if ragged else total_l_blocks

    grid = (row_blocks, n_split, lps)

    def in_map(i, s, j):
        # Clamp so a split's trailing (fully out-of-range) block re-reads a
        # valid block; its contribution is masked to 0 / -inf in the kernel.
        return (i, jnp.minimum(s * lps + j, total_l_blocks - 1))

    psum, pmax = pl.pallas_call(
        functools.partial(_avgmax_pool_kernel, L, tl, lps,
                          first_masked_block, any_mask),
        out_shape=(
            jax.ShapeDtypeStruct((n_split, rows, 1), jnp.float32),
            jax.ShapeDtypeStruct((n_split, rows, 1), jnp.float32),
        ),
        grid_spec=pltpu.PrefetchScalarGridSpec(
            num_scalar_prefetch=0,
            grid=grid,
            in_specs=[pl.BlockSpec((tr, tl), in_map)],
            out_specs=[
                pl.BlockSpec((1, tr, 1), lambda i, s, j: (s, i, 0)),
                pl.BlockSpec((1, tr, 1), lambda i, s, j: (s, i, 0)),
            ],
            scratch_shapes=[
                pltpu.VMEM((tr, 1), jnp.float32),
                pltpu.VMEM((tr, 1), jnp.float32),
            ],
        ),
        compiler_params=pltpu.CompilerParams(
            dimension_semantics=("parallel", "parallel", "arbitrary"),
            vmem_limit_bytes=vmem_limit,
        ),
    )(x2)

    # Tiny cross-split combine in XLA (exact for max, f32 adds for the sum).
    mean = jnp.sum(psum, axis=0) * (1.0 / float(L))      # (rows, 1)
    mx = jnp.max(pmax, axis=0)                           # (rows, 1)
    out = (0.5 * (mean + mx)).astype(x.dtype)
    return out.reshape(N, C, 1, 1, 1)


class AdaptiveAvgMaxPool3d:
    def __init__(self, output_size=1):
        self.output_size = output_size

    def __call__(self, x):
        return adaptive_avgmax_pool3d(x, self.output_size)


def _reference(x):
    xf = x.astype(jnp.float32)
    return 0.5 * (jnp.mean(xf, axis=(2, 3, 4), keepdims=True)
                  + jnp.max(xf, axis=(2, 3, 4), keepdims=True))


if __name__ == "__main__":
    key = jax.random.PRNGKey(0)
    k1, k2, k3, k4 = jax.random.split(key, 4)
    pool = AdaptiveAvgMaxPool3d(output_size=1)

    def _check(y, x, atol, rtol):
        ref = _reference(x)
        assert y.shape == ref.shape
        assert jnp.allclose(y.astype(jnp.float32), ref, atol=atol, rtol=rtol)

    # Case 1: lane-aligned reduction length (L = 8*16*16 = 2048), single block.
    x1 = jax.random.normal(k1, (2, 4, 8, 16, 16), dtype=jnp.float32)
    y1 = jax.block_until_ready(pool(x1))
    _check(y1, x1, 1e-5, 1e-5)

    # Case 2: L = 3*14*14 = 588 (not a multiple of 128) -> gated tail mask.
    x2 = jax.random.normal(k2, (2, 4, 3, 14, 14), dtype=jnp.float32)
    y2 = jax.block_until_ready(pool(x2))
    _check(y2, x2, 1e-5, 1e-5)

    # Case 3: small rows + forced small reduction tile -> exercises the
    # multi-block reduction, the 2-way parallel reduction split (v7x 2-TC
    # path), the clamped fully-out-of-range block, and the gated tail mask.
    x3 = jax.random.normal(k3, (1, 4, 5, 10, 12), dtype=jnp.float32)  # L = 600
    y3 = jax.block_until_ready(adaptive_avgmax_pool3d(x3, 1, _force_tl=128))
    _check(y3, x3, 1e-5, 1e-5)

    # Case 4: bf16 input -> native-dtype max path, padded row block, f32 sums.
    x4 = jax.random.normal(k4, (2, 4, 4, 12, 12), dtype=jnp.bfloat16)
    y4 = jax.block_until_ready(pool(x4))
    _check(y4, x4, 2e-2, 2e-2)

    print("KERNEL_OK")
</pallas_src>

<mosaic_0001>
module attributes {stable_mosaic.version = 11 : i64} {
  func.func @_avgmax_pool_kernel(%arg0: i32, %arg1: i32, %arg2: i32, %arg3: memref<8x2048xf32, #tpu.memory_space<vmem>>, %arg4: memref<1x8x1xf32, #tpu.memory_space<vmem>>, %arg5: memref<1x8x1xf32, #tpu.memory_space<vmem>>, %arg6: memref<8x1xf32, #tpu.memory_space<vmem>>, %arg7: memref<8x1xf32, #tpu.memory_space<vmem>>) attributes {dimension_semantics = [#tpu.dimension_semantics<parallel>, #tpu.dimension_semantics<parallel>, #tpu.dimension_semantics<arbitrary>], iteration_bounds = array<i64: 1, 1, 1>, scalar_prefetch = 0 : i64, scratch_operands = 2 : i64, tpu.core_type = #tpu.core_type<tc>, window_params = [{transform_indices = @transform_0, window_bounds = array<i64: 8, 2048>}, {transform_indices = @transform_1, window_bounds = array<i64: 1, 8, 1>}, {transform_indices = @transform_2, window_bounds = array<i64: 1, 8, 1>}]} {
    %c0_i32 = arith.constant 0 : i32
    %0 = arith.cmpi eq, %arg2, %c0_i32 : i32
    %1 = arith.extui %0 : i1 to i32
    %c0_i32_0 = arith.constant 0 : i32
    %2 = arith.cmpi ne, %1, %c0_i32_0 : i32
    scf.if %2 {
      %cst_13 = arith.constant 0.000000e+00 : f32
      %17 = vector.broadcast %cst_13 : f32 to vector<8x1xf32>
      %c0_14 = arith.constant 0 : index
      %c0_15 = arith.constant 0 : index
      %18 = vector.load %arg6[%c0_14, %c0_15] : memref<8x1xf32, #tpu.memory_space<vmem>>, vector<8x1xf32>
      tpu.vector_store %arg6[%c0_14, %c0_15], %17 {strides = array<i32>} : memref<8x1xf32, #tpu.memory_space<vmem>>, vector<8x1xf32>,
      %cst_16 = arith.constant 0xFF800000 : f32
      %19 = vector.broadcast %cst_16 : f32 to vector<8x1xf32>
      %c0_17 = arith.constant 0 : index
      %c0_18 = arith.constant 0 : index
      %20 = vector.load %arg7[%c0_17, %c0_18] : memref<8x1xf32, #tpu.memory_space<vmem>>, vector<8x1xf32>
      tpu.vector_store %arg7[%c0_17, %c0_18], %19 {strides = array<i32>} : memref<8x1xf32, #tpu.memory_space<vmem>>, vector<8x1xf32>,
    } else {
    }
    %c0 = arith.constant 0 : index
    %c0_1 = arith.constant 0 : index
    %3 = vector.load %arg3[%c0, %c0_1] : memref<8x2048xf32, #tpu.memory_space<vmem>>, vector<8x2048xf32>
    %c0_2 = arith.constant 0 : index
    %c0_3 = arith.constant 0 : index
    %4 = vector.load %arg6[%c0_2, %c0_3] : memref<8x1xf32, #tpu.memory_space<vmem>>, vector<8x1xf32>
    %cst = arith.constant dense<0.000000e+00> : vector<8xf32>
    %5 = vector.multi_reduction <add>, %3, %cst [1] : vector<8x2048xf32> to vector<8xf32>
    %6 = vector.shape_cast %5 : vector<8xf32> to vector<8x1xf32>
    %7 = arith.addf %4, %6 : vector<8x1xf32>
    %c0_4 = arith.constant 0 : index
    %c0_5 = arith.constant 0 : index
    %8 = vector.load %arg6[%c0_4, %c0_5] : memref<8x1xf32, #tpu.memory_space<vmem>>, vector<8x1xf32>
    tpu.vector_store %arg6[%c0_4, %c0_5], %7 {strides = array<i32>} : memref<8x1xf32, #tpu.memory_space<vmem>>, vector<8x1xf32>,
    %c0_6 = arith.constant 0 : index
    %c0_7 = arith.constant 0 : index
    %9 = vector.load %arg7[%c0_6, %c0_7] : memref<8x1xf32, #tpu.memory_space<vmem>>, vector<8x1xf32>
    %cst_8 = arith.constant dense<0xFF800000> : vector<8xf32>
    %10 = vector.multi_reduction <maximumf>, %3, %cst_8 [1] : vector<8x2048xf32> to vector<8xf32>
    %11 = vector.shape_cast %10 : vector<8xf32> to vector<8x1xf32>
    %12 = arith.maximumf %9, %11 : vector<8x1xf32>
    %c0_9 = arith.constant 0 : index
    %c0_10 = arith.constant 0 : index
    %13 = vector.load %arg7[%c0_9, %c0_10] : memref<8x1xf32, #tpu.memory_space<vmem>>, vector<8x1xf32>
    tpu.vector_store %arg7[%c0_9, %c0_10], %12 {strides = array<i32>} : memref<8x1xf32, #tpu.memory_space<vmem>>, vector<8x1xf32>,
    %c0_i32_11 = arith.constant 0 : i32
    %14 = arith.cmpi eq, %arg2, %c0_i32_11 : i32
    %15 = arith.extui %14 : i1 to i32
    %c0_i32_12 = arith.constant 0 : i32
    %16 = arith.cmpi ne, %15, %c0_i32_12 : i32
    scf.if %16 {
      %c0_13 = arith.constant 0 : index
      %c0_14 = arith.constant 0 : index
      %17 = vector.load %arg6[%c0_13, %c0_14] : memref<8x1xf32, #tpu.memory_space<vmem>>, vector<8x1xf32>
      %c0_15 = arith.constant 0 : index
      %c0_16 = arith.constant 0 : index
      %c0_17 = arith.constant 0 : index
      %18 = vector.load %arg4[%c0_15, %c0_16, %c0_17] : memref<1x8x1xf32, #tpu.memory_space<vmem>>, vector<1x8x1xf32>
      %19 = vector.shape_cast %18 : vector<1x8x1xf32> to vector<8x1xf32>
      %20 = vector.shape_cast %17 : vector<8x1xf32> to vector<1x8x1xf32>
      tpu.vector_store %arg4[%c0_15, %c0_16, %c0_17], %20 {strides = array<i32>} : memref<1x8x1xf32, #tpu.memory_space<vmem>>, vector<1x8x1xf32>,
      %c0_18 = arith.constant 0 : index
      %c0_19 = arith.constant 0 : index
      %21 = vector.load %arg7[%c0_18, %c0_19] : memref<8x1xf32, #tpu.memory_space<vmem>>, vector<8x1xf32>
      %c0_20 = arith.constant 0 : index
      %c0_21 = arith.constant 0 : index
      %c0_22 = arith.constant 0 : index
      %22 = vector.load %arg5[%c0_20, %c0_21, %c0_22] : memref<1x8x1xf32, #tpu.memory_space<vmem>>, vector<1x8x1xf32>
      %23 = vector.shape_cast %22 : vector<1x8x1xf32> to vector<8x1xf32>
      %24 = vector.shape_cast %21 : vector<8x1xf32> to vector<1x8x1xf32>
      tpu.vector_store %arg5[%c0_20, %c0_21, %c0_22], %24 {strides = array<i32>} : memref<1x8x1xf32, #tpu.memory_space<vmem>>, vector<1x8x1xf32>,
    } else {
    }
    return
  }
  func.func @transform_0(%arg0: i32, %arg1: i32, %arg2: i32) -> (i32, i32) {
    %c1_i32 = arith.constant 1 : i32
    %0 = arith.muli %arg1, %c1_i32 : i32
    %1 = arith.addi %0, %arg2 : i32
    %c0_i32 = arith.constant 0 : i32
    %2 = arith.minsi %1, %c0_i32 : i32
    %c0_i32_0 = arith.constant 0 : i32
    return %arg0, %2 : i32, i32
  }
  func.func @transform_1(%arg0: i32, %arg1: i32, %arg2: i32) -> (i32, i32, i32) {
    %c0_i32 = arith.constant 0 : i32
    %c0_i32_0 = arith.constant 0 : i32
    return %arg1, %arg0, %c0_i32 : i32, i32, i32
  }
  func.func @transform_2(%arg0: i32, %arg1: i32, %arg2: i32) -> (i32, i32, i32) {
    %c0_i32 = arith.constant 0 : i32
    %c0_i32_0 = arith.constant 0 : i32
    return %arg1, %arg0, %c0_i32 : i32, i32, i32
  }
}

</mosaic_0001>

<bundles_post_ra>
// kernel: tpu_custom_call.1
= control target key start
LH: loop header
LB: loop body
LE: loop exit
PB: predicated region body
PF: predicated region fallthrough
CT: control target
= control target key end

     0   :  { %8 = vsyncpa [#allocation5], 0  ;;  %s141_s9 = smov [#allocation4]   ;;  %s183_s0 = inlined_call_operand.hbm [shape: f32[8,2048], index: 0, kind: input, shape index: {}]   ;;  %s184_s1 = inlined_call_operand.vmem [shape: f32[1,8,1], index: 1, kind: output, shape index: {0}]   ;;  %s185_s2 = inlined_call_operand.vmem [shape: f32[1,8,1], index: 2, kind: output, shape index: {1}]  }
   0x1   :  { %s21_s10 = sshll.u32 %s141_s9, 4  ;;  %s117_s13 = scalar_lea.hbm %s183_s0, 2048  ;;  %s22_s10 = int_to_ptr.vmem [resolvable:$true] %s21_s10 }
   0x2   :  { %p118_p0 = scmp.ne.s32.totalorder %s183_s0, %s117_s13  ;;  %p121_p1 = scmp.lt.u32.totalorder %s117_s13, %s183_s0 }
   0x4   :  { %p123_p2 = pnand %p121_p1, %p118_p0 }
   0x6   :  { %126 = shalt.err (!%p123_p2)
}
   0x7   :  { %s127_s18 = scalar_lea.vmem %s22_s10, 2048  ;;  %p132_p4 = scmp.lt.s32.totalorder %s22_s10, %s22_s10 }
   0x8   :  { %p128_p3 = scmp.ne.s32.totalorder %s22_s10, %s127_s18  ;;  %p133_p5 = scmp.lt.s32.totalorder %s127_s18, %s127_s18 }
   0xa   :  { %p134_p6 = por %p133_p5, %p132_p4 }
   0xc   :  { %p135_p7 = pnand %p134_p6, %p128_p3 }
   0xe   :  { %138 = shalt.err (!%p135_p7)
}
   0xf   :  { %24 = dma.hbm_to_vmem [thread:$0]  %s183_s0, 2048, %s22_s10, [#allocation5]  }
  0x10   :  { %139 = dma.done.wait [#allocation5], 2048  }
  0x11   :  { %140 = vsyncadd [#allocation5], 4294965248  ;;  %vm36_vm0 = vcmask 7168   ;;  %v142_v0 = vmov 0.0   ;;  %v39_v1 = vld [vmem:[#allocation4] sm:$0xff]  ;;  %v40_v2 = vld [vmem:[#allocation4 + $0x8] sm:$0xff] }
  0x12   :  { %37 = vst.msk [vmem:[#allocation2] sm:$0xff] %vm36_vm0, %v142_v0  ;;  %v41_v3 = vld [vmem:[#allocation4 + $0x10] sm:$0xff]  ;;  %v56_v4 = vadd.f32 %v40_v2, %v39_v1  ;;  %v42_v5 = vld [vmem:[#allocation4 + $0x18] sm:$0xff]  ;;  %v43_v7 = vld [vmem:[#allocation4 + $0x20] sm:$0xff]  ;;  %v143_v47 = vmov -inf  }
  0x13   :  { %v44_v9 = vld [vmem:[#allocation4 + $0x28] sm:$0xff]  ;;  %v45_v11 = vld [vmem:[#allocation4 + $0x30] sm:$0xff]  ;;  %v46_v13 = vld [vmem:[#allocation4 + $0x38] sm:$0xff]  ;;  %v77_v18 = vmax.f32 %v39_v1, %v43_v7  ;;  %38 = vst.msk [vmem:[#allocation3] sm:$0xff] %vm36_vm0, %v143_v47 }
  0x14   :  { %v57_v6 = vadd.f32 %v56_v4, %v41_v3  ;;  %v47_v15 = vld [vmem:[#allocation4 + $0x40] sm:$0xff]  ;;  %v48_v17 = vld [vmem:[#allocation4 + $0x48] sm:$0xff]  ;;  %v79_v20 = vmax.f32 %v41_v3, %v45_v11  ;;  %v80_v21 = vmax.f32 %v42_v5, %v46_v13  ;;  %v78_v22 = vmax.f32 %v40_v2, %v44_v9  ;;  %v49_v23 = vld [vmem:[#allocation4 + $0x50] sm:$0xff] }
  0x15   :  { %v50_v25 = vld [vmem:[#allocation4 + $0x58] sm:$0xff]  ;;  %v81_v26 = vmax.f32 %v77_v18, %v47_v15  ;;  %v51_v31 = vld [vmem:[#allocation4 + $0x60] sm:$0xff]  ;;  %v52_v34 = vld [vmem:[#allocation4 + $0x68] sm:$0xff] }
  0x16   :  { %v58_v8 = vadd.f32 %v57_v6, %v42_v5  ;;  %v83_v28 = vmax.f32 %v79_v20, %v49_v23  ;;  %v84_v29 = vmax.f32 %v80_v21, %v50_v25  ;;  %v82_v30 = vmax.f32 %v78_v22, %v48_v17  ;;  %v54_v32 = vld [vmem:[#allocation4 + $0x78] sm:$0xff]  ;;  %v53_v35 = vld [vmem:[#allocation4 + $0x70] sm:$0xff] }
  0x17   :  { %v85_v36 = vmax.f32 %v81_v26, %v51_v31 }
  0x18   :  { %v59_v10 = vadd.f32 %v58_v8, %v43_v7  ;;  %v87_v38 = vmax.f32 %v83_v28, %v53_v35  ;;  %v88_v39 = vmax.f32 %v84_v29, %v54_v32  ;;  %v86_v40 = vmax.f32 %v82_v30, %v52_v34 }
  0x19   :  { %v55_v48 = vld [vmem:[#allocation2] sm:$0xff] }
  0x1a   :  { %v60_v12 = vadd.f32 %v59_v10, %v44_v9  ;;  %v89_v43 = vmax.f32 %v85_v36, %v86_v40  ;;  %v90_v44 = vmax.f32 %v87_v38, %v88_v39  ;;  %v76_v51 = vld [vmem:[#allocation3] sm:$0xff] }
  0x1c   :  { %v61_v14 = vadd.f32 %v60_v12, %v45_v11  ;;  %v91_v46 = vmax.f32 %v89_v43, %v90_v44 }
  0x1e   :  { %v62_v16 = vadd.f32 %v61_v14, %v46_v13 }
  0x20   :  { %v63_v19 = vadd.f32 %v62_v16, %v47_v15 }
  0x22   :  { %v64_v24 = vadd.f32 %v63_v19, %v48_v17 }
  0x24   :  { %v65_v27 = vadd.f32 %v64_v24, %v49_v23 }
  0x26   :  { %v66_v33 = vadd.f32 %v65_v27, %v50_v25 }
  0x28   :  { %v67_v37 = vadd.f32 %v66_v33, %v51_v31 }
  0x2a   :  { %v68_v41 = vadd.f32 %v67_v37, %v52_v34 }
  0x2c   :  { %v69_v42 = vadd.f32 %v68_v41, %v53_v35 }
  0x2e   :  { %v70_v45 = vadd.f32 %v69_v42, %v54_v32 }
  0x30   :  { %71 = vadd.xlane.f32.xlu0 %v70_v45 }
  0x34   :  { %92 = vmax.xlane.f32.xlu0 %v91_v46 }
  0xbd   :  { %v72_v49 = vpop.xlane.xlu0 %71 }
  0xbe   :  { %v73_v50 = vadd.f32 %v72_v49, %v55_v48 }
  0xc0   :  { %75 = vst.msk [vmem:[#allocation2] sm:$0xff] %vm36_vm0, %v73_v50 }
  0xc1   :  { %v93_v52 = vpop.xlane.xlu0 %92 }
  0xc2   :  { %v94_v53 = vmax.f32 %v76_v51, %v93_v52 }
  0xc4   :  { %95 = vst.msk [vmem:[#allocation3] sm:$0xff] %vm36_vm0, %v94_v53 }
  0xc7   :  { %v99_v54 = vld [vmem:[#allocation2] sm:$0xff] }
  0xc8   :  { %100 = vst.msk [vmem:[%s184_s1] sm:$0xff] %vm36_vm0, %v99_v54 }
  0xcb   :  { %v101_v55 = vld [vmem:[#allocation3] sm:$0xff] }
  0xcc   :  { %102 = vst.msk [vmem:[%s185_s2] sm:$0xff] %vm36_vm0, %v101_v55 }
  0xcd   :  { %111 = vsyncpa [#allocation5], 1 }

</bundles_post_ra>
